<compile_context>
chip_gen: v6e
topology: v6e:2x2x1
jax: 0.10.0
libtpu: 0.0.40
codegen_flags: <defaults>
</compile_context>

<pallas_src>
import jax
import jax.numpy as jnp
from jax.experimental import pallas as pl
from jax.experimental.pallas import tpu as pltpu


def tpnn_kernel(zb_ref, embeq_ref, fc_ref, out_ref, hist_ref):
    tn = zb_ref.shape[1]                      # nodes per tile
    max_z, out_sz = embeq_ref.shape           # (num_embeddings, out_size)
    b_pad = out_ref.shape[0]                  # padded number of graphs

    @pl.when(pl.program_id(0) == 0)
    def _init():
        hist_ref[...] = jnp.zeros_like(hist_ref)

    # --- per-step: per-graph atomic-number histogram (one MXU pass, K = TN) ---
    zb = zb_ref[...]                          # [2, TN] int32 (row 0 = z, row 1 = batch, pad = -1)
    z_row = zb[0:1, :]                        # [1, TN]
    b_row = zb[1:2, :]                        # [1, TN]

    # One-hots rebuilt in-kernel on the VPU (nodes on lanes); pad value -1 matches nothing.
    oh_zT = (jax.lax.broadcasted_iota(jnp.int32, (max_z, tn), 0)
             == z_row).astype(jnp.float32)                          # [max_z, TN]
    mask = (jax.lax.broadcasted_iota(jnp.int32, (b_pad, tn), 0)
            == b_row).astype(jnp.float32)                           # [B_pad, TN]

    oh_z = oh_zT.T                                                   # [TN, max_z] (XLU transpose)
    # 0/1 operands are exact in bf16; accumulation stays f32 -> bit-exact, full-rate MXU.
    hist_ref[...] += jnp.dot(mask.astype(jnp.bfloat16), oh_z.astype(jnp.bfloat16),
                             preferred_element_type=jnp.float32)     # [B_pad, max_z]

    # --- finalize once: embedding fold, mean pool, fc head, lane-dense store ---
    @pl.when(pl.program_id(0) == pl.num_programs(0) - 1)
    def _finalize():
        hist = hist_ref[...]                                         # [B_pad, max_z]
        cnt = jnp.sum(hist, axis=-1, keepdims=True)                  # per-graph node counts
        inv = pl.reciprocal(jnp.maximum(cnt, 1.0), approx=False)
        pooled = jnp.dot(hist, embeq_ref[...],
                         preferred_element_type=jnp.float32,
                         precision=jax.lax.Precision.HIGHEST) * inv  # [B_pad, O]
        w1 = fc_ref[0:out_sz, 0:out_sz]                              # [O, O]
        b1 = fc_ref[2 * out_sz:2 * out_sz + 1, 0:out_sz]             # [1, O]
        hid = jnp.maximum(
            jnp.dot(pooled, w1, preferred_element_type=jnp.float32,
                    precision=jax.lax.Precision.HIGHEST) + b1, 0.0)
        w2_blk = fc_ref[out_sz:2 * out_sz, :]                        # [O, 128] (col 0 = w2)
        b2_row = fc_ref[2 * out_sz + 1:2 * out_sz + 2, :]            # [1, 128]
        out_ref[...] = (jnp.dot(hid, w2_blk, preferred_element_type=jnp.float32,
                                precision=jax.lax.Precision.HIGHEST)
                        + b2_row)                                    # [B_pad, 128]


def prepare_tpnn_params(params):
    """Per-model parameter prep; hoisted out of the forward path (call once, reuse)."""
    out_sz = int(params["w_eq"].shape[1])
    # Fold embedding table into the (stand-in) per-node linear map: [max_z, O].
    emb_eq = jnp.dot(params["emb"], params["w_eq"],
                     preferred_element_type=jnp.float32,
                     precision=jax.lax.Precision.HIGHEST)
    # Pack fc params (w1, w2, b1, b2) into a single lane-dense slab.
    rows_pad = ((2 * out_sz + 2 + 7) // 8) * 8
    fcp = jnp.zeros((rows_pad, 128), jnp.float32)
    fcp = fcp.at[0:out_sz, 0:out_sz].set(params["w1"])
    fcp = fcp.at[out_sz:2 * out_sz, 0].set(params["w2"][0])
    fcp = fcp.at[2 * out_sz, 0:out_sz].set(params["b1"][0])
    fcp = fcp.at[2 * out_sz + 1, 0].set(params["b2"][0, 0])
    return {"emb_eq": emb_eq, "fcp": fcp}


def tpnn_forward(z, batch, prepared, *, num_graphs, node_tile=2048):
    emb_eq = prepared["emb_eq"]
    fcp = prepared["fcp"]
    max_z, out_sz = int(emb_eq.shape[0]), int(emb_eq.shape[1])
    rows_pad = int(fcp.shape[0])

    n = int(z.shape[0])
    n_pad = pl.cdiv(n, node_tile) * node_tile
    b_pad = max(8, ((num_graphs + 7) // 8) * 8)

    # Single lane-dense int32 slab: row 0 = z, row 1 = batch; padding = -1 (matches nothing).
    zb = jnp.full((2, n_pad), -1, dtype=jnp.int32)
    zb = zb.at[0, :n].set(z.astype(jnp.int32)).at[1, :n].set(batch.astype(jnp.int32))

    out_full = pl.pallas_call(
        tpnn_kernel,
        out_shape=jax.ShapeDtypeStruct((b_pad, 128), jnp.float32),
        grid_spec=pltpu.PrefetchScalarGridSpec(
            num_scalar_prefetch=0,
            grid=(n_pad // node_tile,),
            in_specs=[
                pl.BlockSpec((2, node_tile), lambda i: (0, i)),      # packed z/batch indices
                pl.BlockSpec((max_z, out_sz), lambda i: (0, 0)),     # folded emb table (resident)
                pl.BlockSpec((rows_pad, 128), lambda i: (0, 0)),     # packed fc params (resident)
            ],
            out_specs=pl.BlockSpec((b_pad, 128), lambda i: (0, 0)),
            scratch_shapes=[
                pltpu.VMEM((b_pad, max_z), jnp.float32),             # per-graph z histogram
            ],
        ),
        compiler_params=pltpu.CompilerParams(
            dimension_semantics=("arbitrary",),
            vmem_limit_bytes=32 * 1024 * 1024,
        ),
    )(zb, emb_eq, fcp)

    return out_full[:num_graphs, :1]


def reference_forward(z, batch, params, *, num_graphs):
    feat = params["emb"][z]                                                   # [N, E]
    h = jnp.dot(feat, params["w_eq"], precision=jax.lax.Precision.HIGHEST)    # [N, O]
    pool = jax.nn.one_hot(batch, num_graphs, dtype=jnp.float32).T             # [B, N]
    pooled = jnp.dot(pool, h, precision=jax.lax.Precision.HIGHEST)
    pooled = pooled / jnp.maximum(pool.sum(axis=1, keepdims=True), 1.0)       # [B, O]
    hid = jnp.maximum(
        jnp.dot(pooled, params["w1"], precision=jax.lax.Precision.HIGHEST)
        + params["b1"], 0.0)
    return jnp.sum(hid * params["w2"], axis=-1, keepdims=True) + params["b2"]


if __name__ == "__main__":
    # Small shapes consistent with the module.
    MAX_Z = 16       # num_embeddings
    EMB = 32         # emb_size  (input_representations[0][0][0])
    OUT = 32         # out_size  (output_representations[-1][0][0])
    B = 3            # number of graphs
    sizes = [70, 60, 70]
    N = sum(sizes)   # total nodes across the batch

    key = jax.random.PRNGKey(0)
    k_emb, k_eq, k_w1, k_b1, k_w2, k_b2, k_z = jax.random.split(key, 7)

    emb = jax.random.normal(k_emb, (MAX_Z, EMB), dtype=jnp.float32) * 0.1
    emb = emb.at[0].set(0.0)  # padding_idx=0
    params = {
        "emb": emb,
        "w_eq": jax.random.normal(k_eq, (EMB, OUT), dtype=jnp.float32) * 0.1,
        "w1": jax.random.normal(k_w1, (OUT, OUT), dtype=jnp.float32) * 0.1,
        "b1": jax.random.normal(k_b1, (1, OUT), dtype=jnp.float32) * 0.1,
        "w2": jax.random.normal(k_w2, (1, OUT), dtype=jnp.float32) * 0.1,
        "b2": jax.random.normal(k_b2, (1, 1), dtype=jnp.float32) * 0.1,
    }

    # graph.z (atomic numbers, includes padding-index nodes) and graph.batch
    z = jax.random.randint(k_z, (N,), 1, MAX_Z).astype(jnp.int32)
    z = z.at[3].set(0).at[100].set(0)
    batch = jnp.concatenate(
        [jnp.full((s,), g, dtype=jnp.int32) for g, s in enumerate(sizes)])

    # Hoisted parameter prep (once per model, reused across forward calls).
    prepared = prepare_tpnn_params(params)
    jax.block_until_ready(prepared)

    ref = reference_forward(z, batch, params, num_graphs=B)

    # Multi-tile path (exercises cross-step histogram accumulation) and default large tile.
    out_small = tpnn_forward(z, batch, prepared, num_graphs=B, node_tile=128)
    out_big = tpnn_forward(z, batch, prepared, num_graphs=B)
    jax.block_until_ready((out_small, out_big))

    assert out_small.shape == (B, 1) and out_big.shape == (B, 1)
    assert jnp.allclose(out_small, ref, atol=1e-5, rtol=1e-5)
    assert jnp.allclose(out_big, ref, atol=1e-5, rtol=1e-5)

    print("KERNEL_OK")
</pallas_src>

<mosaic_0001>
module attributes {stable_mosaic.version = 11 : i64} {
  func.func @tpnn_kernel(%arg0: i32, %arg1: memref<2x128xi32, #tpu.memory_space<vmem>>, %arg2: memref<16x32xf32, #tpu.memory_space<vmem>>, %arg3: memref<72x128xf32, #tpu.memory_space<vmem>>, %arg4: memref<8x128xf32, #tpu.memory_space<vmem>>, %arg5: memref<8x16xf32, #tpu.memory_space<vmem>>) attributes {dimension_semantics = [#tpu.dimension_semantics<arbitrary>], iteration_bounds = array<i64: 2>, scalar_prefetch = 0 : i64, scratch_operands = 1 : i64, tpu.core_type = #tpu.core_type<tc>, window_params = [{transform_indices = @transform_0, window_bounds = array<i64: 2, 128>}, {pipeline_mode = #tpu.pipeline_mode<synchronous>, transform_indices = @transform_1, window_bounds = array<i64: 16, 32>}, {pipeline_mode = #tpu.pipeline_mode<synchronous>, transform_indices = @transform_2, window_bounds = array<i64: 72, 128>}, {pipeline_mode = #tpu.pipeline_mode<synchronous>, transform_indices = @transform_3, window_bounds = array<i64: 8, 128>}]} {
    %c0_i32 = arith.constant 0 : i32
    %0 = arith.cmpi eq, %arg0, %c0_i32 : i32
    %1 = arith.extui %0 : i1 to i32
    %c0_i32_0 = arith.constant 0 : i32
    %2 = arith.cmpi ne, %1, %c0_i32_0 : i32
    scf.if %2 {
      %cst_7 = arith.constant 0.000000e+00 : f32
      %26 = vector.broadcast %cst_7 : f32 to vector<8x16xf32>
      %c0_8 = arith.constant 0 : index
      %c0_9 = arith.constant 0 : index
      %27 = vector.load %arg5[%c0_8, %c0_9] : memref<8x16xf32, #tpu.memory_space<vmem>>, vector<8x16xf32>
      tpu.vector_store %arg5[%c0_8, %c0_9], %26 {strides = array<i32>} : memref<8x16xf32, #tpu.memory_space<vmem>>, vector<8x16xf32>,
    } else {
    }
    %c0 = arith.constant 0 : index
    %c0_1 = arith.constant 0 : index
    %3 = vector.load %arg1[%c0, %c0_1] : memref<2x128xi32, #tpu.memory_space<vmem>>, vector<2x128xi32>
    %4 = vector.extract_strided_slice %3 {offsets = [0, 0], sizes = [1, 128], strides = [1, 1]} : vector<2x128xi32> to vector<1x128xi32>
    %5 = vector.extract_strided_slice %3 {offsets = [1, 0], sizes = [1, 128], strides = [1, 1]} : vector<2x128xi32> to vector<1x128xi32>
    %6 = tpu.iota {dimensions = array<i32: 0>} : vector<16x128xi32>
    %7 = vector.broadcast %4 : vector<1x128xi32> to vector<16x128xi32>
    %8 = arith.cmpi eq, %6, %7 : vector<16x128xi32>
    %9 = arith.extui %8 : vector<16x128xi1> to vector<16x128xi32>
    %10 = arith.sitofp %9 : vector<16x128xi32> to vector<16x128xf32>
    %11 = tpu.iota {dimensions = array<i32: 0>} : vector<8x128xi32>
    %12 = vector.broadcast %5 : vector<1x128xi32> to vector<8x128xi32>
    %13 = arith.cmpi eq, %11, %12 : vector<8x128xi32>
    %14 = arith.extui %13 : vector<8x128xi1> to vector<8x128xi32>
    %15 = arith.sitofp %14 : vector<8x128xi32> to vector<8x128xf32>
    %16 = tpu.transpose %10, [1, 0] : vector<16x128xf32> -> vector<128x16xf32>
    %c0_2 = arith.constant 0 : index
    %c0_3 = arith.constant 0 : index
    %17 = vector.load %arg5[%c0_2, %c0_3] : memref<8x16xf32, #tpu.memory_space<vmem>>, vector<8x16xf32>
    %18 = arith.truncf %15 : vector<8x128xf32> to vector<8x128xbf16>
    %19 = arith.truncf %16 : vector<128x16xf32> to vector<128x16xbf16>
    %cst = arith.constant dense<0.000000e+00> : vector<8x16xf32>
    %20 = tpu.matmul %18, %19, %cst {dimension_numbers = #tpu.dot_dimension_numbers<[1], [0], [0], [1], [0, 0, 1, 1], [], []>} : vector<8x128xbf16>, vector<128x16xbf16>, vector<8x16xf32> -> vector<8x16xf32>
    %21 = arith.addf %17, %20 : vector<8x16xf32>
    %c0_4 = arith.constant 0 : index
    %c0_5 = arith.constant 0 : index
    %22 = vector.load %arg5[%c0_4, %c0_5] : memref<8x16xf32, #tpu.memory_space<vmem>>, vector<8x16xf32>
    tpu.vector_store %arg5[%c0_4, %c0_5], %21 {strides = array<i32>} : memref<8x16xf32, #tpu.memory_space<vmem>>, vector<8x16xf32>,
    %c1_i32 = arith.constant 1 : i32
    %23 = arith.cmpi eq, %arg0, %c1_i32 : i32
    %24 = arith.extui %23 : i1 to i32
    %c0_i32_6 = arith.constant 0 : i32
    %25 = arith.cmpi ne, %24, %c0_i32_6 : i32
    scf.if %25 {
      %c0_7 = arith.constant 0 : index
      %c0_8 = arith.constant 0 : index
      %26 = vector.load %arg5[%c0_7, %c0_8] : memref<8x16xf32, #tpu.memory_space<vmem>>, vector<8x16xf32>
      %cst_9 = arith.constant dense<0.000000e+00> : vector<8xf32>
      %27 = vector.multi_reduction <add>, %26, %cst_9 [1] : vector<8x16xf32> to vector<8xf32>
      %28 = vector.shape_cast %27 : vector<8xf32> to vector<8x1xf32>
      %cst_10 = arith.constant 1.000000e+00 : f32
      %29 = vector.broadcast %cst_10 : f32 to vector<8x1xf32>
      %30 = arith.maximumf %28, %29 : vector<8x1xf32>
      %31 = tpu.reciprocal %30 : vector<8x1xf32> -> vector<8x1xf32>
      %c0_11 = arith.constant 0 : index
      %c0_12 = arith.constant 0 : index
      %32 = vector.load %arg2[%c0_11, %c0_12] : memref<16x32xf32, #tpu.memory_space<vmem>>, vector<16x32xf32>
      %cst_13 = arith.constant dense<0.000000e+00> : vector<8x32xf32>
      %33 = tpu.matmul %26, %32, %cst_13 {dimension_numbers = #tpu.dot_dimension_numbers<[1], [0], [0], [1], [0, 0, 1, 1], [], []>, precision = #tpu.contract_precision<fp32>} : vector<8x16xf32>, vector<16x32xf32>, vector<8x32xf32> -> vector<8x32xf32>
      %34 = vector.broadcast %31 : vector<8x1xf32> to vector<8x32xf32>
      %35 = arith.mulf %33, %34 : vector<8x32xf32>
      %c0_14 = arith.constant 0 : index
      %c0_15 = arith.constant 0 : index
      %36 = vector.load %arg3[%c0_14, %c0_15] : memref<72x128xf32, #tpu.memory_space<vmem>>, vector<32x32xf32>
      %c64 = arith.constant 64 : index
      %c0_16 = arith.constant 0 : index
      %37 = vector.load %arg3[%c64, %c0_16] : memref<72x128xf32, #tpu.memory_space<vmem>>, vector<1x32xf32>
      %cst_17 = arith.constant dense<0.000000e+00> : vector<8x32xf32>
      %38 = tpu.matmul %35, %36, %cst_17 {dimension_numbers = #tpu.dot_dimension_numbers<[1], [0], [0], [1], [0, 0, 1, 1], [], []>, precision = #tpu.contract_precision<fp32>} : vector<8x32xf32>, vector<32x32xf32>, vector<8x32xf32> -> vector<8x32xf32>
      %39 = vector.broadcast %37 : vector<1x32xf32> to vector<8x32xf32>
      %40 = arith.addf %38, %39 : vector<8x32xf32>
      %cst_18 = arith.constant 0.000000e+00 : f32
      %41 = vector.broadcast %cst_18 : f32 to vector<8x32xf32>
      %42 = arith.maximumf %40, %41 : vector<8x32xf32>
      %c32 = arith.constant 32 : index
      %c0_19 = arith.constant 0 : index
      %43 = vector.load %arg3[%c32, %c0_19] : memref<72x128xf32, #tpu.memory_space<vmem>>, vector<32x128xf32>
      %c65 = arith.constant 65 : index
      %c0_20 = arith.constant 0 : index
      %44 = vector.load %arg3[%c65, %c0_20] : memref<72x128xf32, #tpu.memory_space<vmem>>, vector<1x128xf32>
      %cst_21 = arith.constant dense<0.000000e+00> : vector<8x128xf32>
      %45 = tpu.matmul %42, %43, %cst_21 {dimension_numbers = #tpu.dot_dimension_numbers<[1], [0], [0], [1], [0, 0, 1, 1], [], []>, precision = #tpu.contract_precision<fp32>} : vector<8x32xf32>, vector<32x128xf32>, vector<8x128xf32> -> vector<8x128xf32>
      %46 = vector.broadcast %44 : vector<1x128xf32> to vector<8x128xf32>
      %47 = arith.addf %45, %46 : vector<8x128xf32>
      %c0_22 = arith.constant 0 : index
      %c0_23 = arith.constant 0 : index
      %48 = vector.load %arg4[%c0_22, %c0_23] : memref<8x128xf32, #tpu.memory_space<vmem>>, vector<8x128xf32>
      tpu.vector_store %arg4[%c0_22, %c0_23], %47 {strides = array<i32>} : memref<8x128xf32, #tpu.memory_space<vmem>>, vector<8x128xf32>,
    } else {
    }
    return
  }
  func.func @transform_0(%arg0: i32) -> (i32, i32) {
    %c0_i32 = arith.constant 0 : i32
    %c0_i32_0 = arith.constant 0 : i32
    return %c0_i32, %arg0 : i32, i32
  }
  func.func @transform_1(%arg0: i32) -> (i32, i32) {
    %c0_i32 = arith.constant 0 : i32
    %c0_i32_0 = arith.constant 0 : i32
    %c0_i32_1 = arith.constant 0 : i32
    return %c0_i32, %c0_i32_0 : i32, i32
  }
  func.func @transform_2(%arg0: i32) -> (i32, i32) {
    %c0_i32 = arith.constant 0 : i32
    %c0_i32_0 = arith.constant 0 : i32
    %c0_i32_1 = arith.constant 0 : i32
    return %c0_i32, %c0_i32_0 : i32, i32
  }
  func.func @transform_3(%arg0: i32) -> (i32, i32) {
    %c0_i32 = arith.constant 0 : i32
    %c0_i32_0 = arith.constant 0 : i32
    %c0_i32_1 = arith.constant 0 : i32
    return %c0_i32, %c0_i32_0 : i32, i32
  }
}

</mosaic_0001>

<bundles_post_ra>
// kernel: tpu_custom_call.1
= control target key start
LH: loop header
LB: loop body
LE: loop exit
PB: predicated region body
PF: predicated region fallthrough
CT: control target
= control target key end

     0   :  { %8 = vsyncpa [#allocation4], 0  ;;  %s2786_s0 = inlined_call_operand.hbm [shape: s32[2,256], index: 0, kind: input, shape index: {}]   ;;  %s2787_s1 = inlined_call_operand.hbm [shape: f32[16,32], index: 1, kind: input, shape index: {}]   ;;  %s2788_s2 = inlined_call_operand.hbm [shape: f32[72,128], index: 2, kind: input, shape index: {}]   ;;  %s2789_s3 = inlined_call_operand.hbm [shape: f32[8,128], index: 3, kind: output, shape index: {}]  }
   0x1   :  { %10 = vsyncpa [#allocation4 + $0x1], 0 }
   0x2   :  { %11 = vsyncpa [#allocation7], 0 }
   0x3   :  { %12 = vsyncpa [#allocation5], 0  ;;  %s2426_s12 = smov 0   ;;  %s2428_s13 = smov 0  }
   0x4   :  { %s2430_s14 = smov 0   ;;  %s2432_s15 = smov 0  }
   0x5 LB: > { %s2445_s16 = sadd.s32 4294967295, %s2392_s15   ;;  %p38_p0 = scmp.ne.s32.totalorder %s2384_s13, %s2380_s12  ;;  %s2392_s15 = sphi %s2432_s15, %s2805_s15   ;;  %s2388_s14 = sphi %s2430_s14, %s2804_s14   ;;  %s2384_s13 = sphi %s2428_s13, %s2803_s13   ;;  %s2380_s12 = sphi %s2426_s12, %s2802_s12  }
   0x6   : > { %p2790_p1 = scmp.eq.s32.totalorder %s2445_s16, 0  ;;  %p1865_p2 = scmp.ge.s32.totalorder %s2392_s15, 1 }
   0x7   : > { %p112_p3 = scmp.lt.s32.totalorder %s2392_s15, 3  ;;  %s2394_s19 = smov [#allocation6]  }
   0x8   : > { %p2454_p5 = por %p2790_p1, %p38_p0  ;;  %s124_s20 = sshll.u32 %s2394_s19, 4  ;;  %s125_s20 = int_to_ptr.vmem [resolvable:$true] %s124_s20 }
   0x9   : > { %p2458_p6 = pnand %p1865_p2, %p112_p3  ;;  %s2395_s22 = smov [#allocation8]  }
   0xa   : > { %s2793_s17 = scalar_select %p2454_p5, 1, 0 }
   0xb   : > { %s2794_s18 = scalar_select %p2458_p6, 1, 0 }
   0xc   : > { %p2183_p7 = pneg %p2458_p6  ;;  %s137_s23 = sshll.u32 %s2395_s22, 4  ;;  %s138_s23 = int_to_ptr.vmem [resolvable:$true] %s137_s23 }
   0xd   : > { %s2257_s24 = scalar_lea.vmem %s125_s20, 256  ;;  %p2265_p13 = scmp.lt.s32.totalorder %s125_s20, %s125_s20 }
   0xe   : > { %p2466_p8 = pnand %p2183_p7, %p2790_p1  ;;  %p2258_p10 = scmp.ne.s32.totalorder %s125_s20, %s2257_s24 }
   0xf   : > { %p2266_p0 = scmp.lt.s32.totalorder %s2257_s24, %s2257_s24 }
  0x10   : > { %p2248_p9 = pneg %p2466_p8 }
  0x11   : > { %p2267_p2 = por %p2266_p0, %p2265_p13 }
  0x12   : > { %p2260_p11 = pnand %p2258_p10, %p2248_p9 }
  0x14   : > { %p2261_p12 = pneg %p2260_p11 }
  0x16   : > { %p2268_p3 = pnand %p2267_p2, %p2261_p12 }
  0x18   : > { %2271 = shalt.err (!%p2268_p3)
}
  0x19   : > { %s2396_s25 = smov 128   ;;  %s2397_s26 = smov 8  }
  0x1a   : > { %2186 = dma.hbm_to_vmem [thread:$0]  (!%p2466_p8), %s2787_s1, 256, %s125_s20, [#allocation7], %s2396_s25, %s2396_s25, %s2397_s26  }
  0x1b   : > { %s2283_s29 = scalar_lea.vmem %s138_s23, 1152  ;;  %p2291_p4 = scmp.lt.s32.totalorder %s138_s23, %s138_s23 }
  0x1c   : > { %p2284_p7 = scmp.ne.s32.totalorder %s138_s23, %s2283_s29  ;;  %p2292_p1 = scmp.lt.s32.totalorder %s2283_s29, %s2283_s29 }
  0x1e   : > { %p2286_p10 = pnand %p2284_p7, %p2248_p9  ;;  %p2293_p13 = por %p2292_p1, %p2291_p4 }
  0x20   : > { %p2287_p11 = pneg %p2286_p10 }
  0x22   : > { %p2294_p12 = pnand %p2293_p13, %p2287_p11 }
  0x24   : > { %2297 = shalt.err (!%p2294_p12)
}
  0x25   : > { %2189 = dma.hbm_to_vmem [thread:$0]  (!%p2466_p8), %s2788_s2, 1152, %s138_s23, [#allocation7], %s2396_s25, %s2396_s25, %s2397_s26  }
  0x26   : > { %s2489_s5 = sadd.s32 1, %s2392_s15   ;;  %s25_s6 = sadd.s32 1, %s2388_s14 }
  0x27   : > { %s22_s7 = ssub.s32 %s2392_s15, %s2489_s5  ;;  %p32_p1 = scmp.ne.s32.totalorder %s2388_s14, %s2384_s13 }
  0x28   : > { %p23_p4 = scmp.eq.s32.totalorder %s22_s7, 0  ;;  %p33_p9 = scmp.eq.s32.totalorder %s2392_s15, 0 }
  0x29   : > { %p2196_p0 = scmp.lt.s32.totalorder %s2392_s15, 2  ;;  %s151_s8 = sand.u32 1, %s2388_s14  }
  0x2a   : > { %s2500_s9 = scalar_select %p23_p4, %s2388_s14, %s25_s6  }
  0x2b   : > { %p34_p2 = por %p33_p9, %p32_p1  ;;  %s1869_s10 = sshll.u32 %s151_s8, 1 }
  0x2c   : > { %s1870_s11 = sshll.u32 %s2392_s15, 5  ;;  %s155_s21 = scalar_lea.vmem [#allocation3], %s1869_s10 }
  0x2d   : > { %s2506_s20 = scalar_lea.hbm %s2786_s0, %s1870_s11  ;;  %s162_s22 = sshll.u32 %s155_s21, 4  ;;  %s163_s22 = int_to_ptr.vmem [resolvable:$true] %s162_s22 }
  0x2e   : > { %p2508_p8 = pnand %p2196_p0, %p34_p2  ;;  %s152_s24 = scalar_lea.sflag [#allocation4], %s151_s8 }
  0x2f   : > { %s2298_s25 = scalar_lea.hbm %s2506_s20, 32  ;;  %s2303_s27 = scalar_lea.hbm %s2786_s0, 64 }
  0x30   : > { %p2299_p3 = scmp.ne.s32.totalorder %s2506_s20, %s2298_s25  ;;  %p2300_p7 = pneg %p2508_p8 }
  0x31   : > { %p2304_p13 = scmp.lt.s32.totalorder %s2506_s20, %s2786_s0  ;;  %p2305_p12 = scmp.lt.s32.totalorder %s2303_s27, %s2298_s25 }
  0x32   : > { %p2301_p10 = pnand %p2300_p7, %p2299_p3 }
  0x33   : > { %p2306_p1 = por %p2305_p12, %p2304_p13 }
  0x34   : > { %p2302_p11 = pneg %p2301_p10 }
  0x36   : > { %p2307_p4 = pnand %p2306_p1, %p2302_p11 }
  0x38   : > { %2310 = shalt.err (!%p2307_p4)
}
  0x39   : > { %s2311_s30 = scalar_lea.vmem %s163_s22, 32  ;;  %s2398_s4 = smov [#allocation3]  }
  0x3a   : > { %p2312_p9 = scmp.ne.s32.totalorder %s163_s22, %s2311_s30  ;;  %s2316_s6 = sshll.u32 %s2398_s4, 4  ;;  %s2317_s6 = int_to_ptr.vmem [resolvable:$false] %s2316_s6 }
  0x3b   : > { %s2318_s7 = scalar_lea.vmem %s2317_s6, 64  ;;  %p2319_p3 = scmp.lt.s32.totalorder %s163_s22, %s2317_s6 }
  0x3c   : > { %p2314_p0 = pnand %p2312_p9, %p2300_p7  ;;  %p2320_p10 = scmp.lt.s32.totalorder %s2318_s7, %s2311_s30 }
  0x3e   : > { %p2315_p2 = pneg %p2314_p0  ;;  %p2321_p5 = por %p2320_p10, %p2319_p3 }
  0x40   : > { %p2322_p6 = pnand %p2321_p5, %p2315_p2 }
  0x42   : > { %2325 = shalt.err (!%p2322_p6)
}
  0x43   : > { %2193 = dma.hbm_to_vmem [thread:$0]  (!%p2508_p8), %s2506_s20, 32, %s163_s22, %s152_s24  }
  0x44   : > { %p2797_p11 = scmp.ne.s32.totalorder %s2794_s18, 0 }
  0x45   : > { %s173_s8 = sand.u32 (!%p2797_p11), 1, %s2384_s13   ;;  %p2798_p7 = scmp.ne.s32.totalorder (!%p2797_p11), %s2793_s17, 0 }
  0x46   : > { %171 = sbr.rel (%p2797_p11) target bundleno = 1208 (0x4b8), region = 32  ;;  %s1872_s10 = sshll.u32 (!%p2797_p11), %s173_s8, 1 }
  0x47   : > { %s174_s11 = scalar_lea.sflag (!%p2797_p11), [#allocation4], %s173_s8  ;;  %s177_s12 = scalar_lea.vmem (!%p2797_p11), [#allocation3], %s1872_s10 }
  0x4b   : > { %2367 = dma.done.wait (%p2798_p7), %s174_s11, 32  }
  0x4c   : > { %2369 = vsyncadd (%p2798_p7), %s174_s11, 4294967264  ;;  %p2799_p5 = scmp.eq.s32.totalorder %s2445_s16, 0 }
  0x4e   : > { %2371 = dma.done.wait (%p2799_p5), [#allocation7], 1408   ;;  %p2800_p6 = pmov %p2799_p5 }
  0x4f   : > { %p2801_p8 = scmp.ne.s32.totalorder %s2445_s16, 0 }
  0x50   : > { %2373 = vsyncadd (%p2800_p6), [#allocation7], 4294965888 }
  0x51   : > { %207 = sbr.rel (%p2801_p8) target bundleno = 88 (0x58), region = 48 }
  0x56   : > { %vm208_vm0 = vcmask 130048   ;;  %v2399_v0 = vmov 0.0  }
  0x57   : > { %209 = vst.msk [vmem:[#allocation2] sm:$0xff] %vm208_vm0, %v2399_v0 }
  0x58 PF: > { %v211_v1 = vlaneseq  ;;  %v2400_v2 = vmov 0.0   ;;  %v210_v4 = vld [vmem:[%s177_s12] sm:$0x3]  ;;  %vm2401_vm3 = vmmov 0   ;;  %v2402_v36 = vmov 1.0|1.0  }
  0x59   : > { %1975 = vmatprep.subr.bf16.mxu0 %v2400_v2  ;;  %1991 = vmatprep.mubr.msk.bf16.mxu0 %vm2401_vm3, %v2400_v2  ;;  %vm314_vm6 = vcmask 130048   ;;  %p1881_p13 = scmp.ne.s32.totalorder %s2445_s16, 1 }
  0x5a   : > { %v212_v3 = vshrl.u32 %v211_v1, 7 }
  0x5c   : > { %v216_v5 = vsub.s32 0, %v212_v3  ;;  %v213_v6 = vadd.s32 8, %v212_v3  ;;  %v226_v33 = vsub.s32 1, %v212_v3 }
  0x5e   : > { %v217_v7 = vrot.slane %v210_v4, %v216_v5  ;;  %v227_v35 = vrot.slane %v210_v4, %v226_v33  ;;  %v261_v37 = vld [vmem:[#allocation2] sm:$0xff] }
  0x60   : > { %vm218_vm1 = vcmp.eq.s32.totalorder %v212_v3, %v217_v7  ;;  %vm219_vm2 = vcmp.eq.s32.totalorder %v213_v6, %v217_v7  ;;  %vm228_vm4 = vcmp.eq.s32.totalorder %v212_v3, %v227_v35 }
  0x61   : > { %v1876_v8 = vsel %vm218_vm1, 1.0, %v2400_v2  ;;  %v1877_v9 = vsel %vm219_vm2, 1.0, %v2400_v2  ;;  %vm1879_vm5 = vmpackc.low %vm228_vm4, %vm228_vm4 }
  0x62   : > { %229 = vxpose.xlu0.b32.start [1/2] (short) %v1876_v8, 128 }
  0x66   : > { %230 = vxpose.xlu0.b32.end [2/2] (short) %v1877_v9, 128 }
  0xde   : > { %v245_v10 = vpop.trf.xlu0 }
  0xe2   : > { %v246_v11 = vpop.trf.xlu0 }
  0xe3   : > { %v265_v12 = vpack.c.bf16 %v246_v11, %v245_v10 }
  0xe6   : > { %v247_v13 = vpop.trf.xlu0 }
  0xea   : > { %v248_v14 = vpop.trf.xlu0 }
  0xeb   : > { %v266_v15 = vpack.c.bf16 %v248_v14, %v247_v13 }
  0xee   : > { %v249_v16 = vpop.trf.xlu0 }
  0xf2   : > { %v250_v17 = vpop.trf.xlu0 }
  0xf3   : > { %v267_v34 = vpack.c.bf16 %v250_v17, %v249_v16 }
  0xf6   : > { %v251_v18 = vpop.trf.xlu0 }
  0xfa   : > { %v252_v19 = vpop.trf.xlu0 }
  0xfb   : > { %v268_v32 = vpack.c.bf16 %v252_v19, %v251_v18 }
  0xfe   : > { %v253_v20 = vpop.trf.xlu0 }
 0x102   : > { %v254_v21 = vpop.trf.xlu0 }
 0x103   : > { %v269_v31 = vpack.c.bf16 %v254_v21, %v253_v20 }
 0x106   : > { %v255_v22 = vpop.trf.xlu0 }
 0x10a   : > { %v256_v23 = vpop.trf.xlu0 }
 0x10b   : > { %v270_v30 = vpack.c.bf16 %v256_v23, %v255_v22 }
 0x10e   : > { %v257_v24 = vpop.trf.xlu0 }
 0x112   : > { %v258_v25 = vpop.trf.xlu0 }
 0x113   : > { %v271_v29 = vpack.c.bf16 %v258_v25, %v257_v24 }
 0x116   : > { %v259_v26 = vpop.trf.xlu0 }
 0x11a   : > { %v260_v27 = vpop.trf.xlu0 }
 0x11b   : > { %v272_v28 = vpack.c.bf16 %v260_v27, %v259_v26 }
 0x11d   : > { %1976 = vmatpush3.bf16.msra.mxu0 %v272_v28 }
 0x11e   : > { %1977 = vmatprep.subr.bf16.mxu0 %v2400_v2 }
 0x121   : > { %1978 = vmatpush3.bf16.msra.mxu0 %v271_v29 }
 0x122   : > { %1979 = vmatprep.subr.bf16.mxu0 %v2400_v2 }
 0x125   : > { %1980 = vmatpush3.bf16.msra.mxu0 %v270_v30 }
 0x126   : > { %1981 = vmatprep.subr.bf16.mxu0 %v2400_v2 }
 0x129   : > { %1982 = vmatpush3.bf16.msra.mxu0 %v269_v31 }
 0x12a   : > { %1983 = vmatprep.subr.bf16.mxu0 %v2400_v2 }
 0x12d   : > { %1984 = vmatpush3.bf16.msra.mxu0 %v268_v32 }
 0x12e   : > { %1985 = vmatprep.subr.bf16.mxu0 %v2400_v2 }
 0x131   : > { %1986 = vmatpush3.bf16.msra.mxu0 %v267_v34 }
 0x132   : > { %1987 = vmatprep.subr.bf16.mxu0 %v2400_v2 }
 0x135   : > { %1988 = vmatpush3.bf16.msra.mxu0 %v266_v15 }
 0x136   : > { %1989 = vmatprep.subr.bf16.mxu0 %v2400_v2 }
 0x139   : > { %1990 = vmatpush3.bf16.msra.mxu0 %v265_v12 }
 0x13c   : > { %1992 = vmatmul.mubr.msk.bf16.vlgmr.msra.gmra.mxu0 %vm1879_vm5, %v2402_v36 }
 0x1fc   : > { %v307_v38 = vpop.f32.mrf.mxu0 }
 0x1fd   : > { %v313_v39 = vadd.f32 %v307_v38, %v261_v37 }
 0x1fe   : > { %v1993_v40 = vpop.f32.mrf.mxu0  ;;  %319 = sbr.rel (%p1881_p13) target bundleno = 1193 (0x4a9), region = 52 }
 0x1ff   : > { %315 = vst.msk [vmem:[#allocation2] sm:$0xff] %vm314_vm6, %v313_v39 }
 0x200   : > { %v310_v41 = vpop.f32.mrf.mxu0 }
 0x202   : > { %v1994_v42 = vpop.f32.mrf.mxu0 }
 0x203   : > { %v327_v43 = vld [vmem:[#allocation6 + $0x8] sm:$0xff]  ;;  %v326_v44 = vld [vmem:[#allocation6] sm:$0xff]  ;;  %v2403_v46 = vmov 0.0   ;;  %vm2404_vm7 = vmmov 0   ;;  %v792_v5 = vld [vmem:[#allocation8 + $0x8] sm:$0xff]  ;;  %vm800_vm8 = vcmask 261120  }
 0x204   : > { %1995 = vmatprep.subr.mxu0 %v2403_v46  ;;  %v360_v47 = vand.u32 4294901760, %v327_v43  ;;  %2002 = vmatprep.subr.mxu1 %v2403_v46  ;;  %v363_v48 = vand.u32 4294901760, %v326_v44  ;;  %v794_v0 = vld [vmem:[#allocation8 + $0x18] sm:$0xff]  ;;  %v793_v2 = vld [vmem:[#allocation8 + $0x10] sm:$0xff]  ;;  %v2586_v8 = vand.u32 4294901760, %v792_v5  ;;  %v791_v9 = vld [vmem:[#allocation8] sm:$0xff] }
 0x205   : > { %1999 = vmatprep.mubr.msk.f32.mxu0 %vm2404_vm7, %v2403_v46  ;;  %2006 = vmatprep.mubr.msk.f32.mxu1 %vm2404_vm7, %v2403_v46  ;;  %v2573_v1 = vand.u32 4294901760, %v794_v0  ;;  %v2578_v4 = vand.u32 4294901760, %v793_v2  ;;  %v2597_v13 = vand.u32 4294901760, %v791_v9 }
 0x206   : > { %v320_v45 = vld [vmem:[#allocation2] sm:$0xff]  ;;  %1996 = vmatpush3.msra.mxu0 %v360_v47  ;;  %v438_v52 = vsub.f32 %v327_v43, %v360_v47  ;;  %v445_v53 = vsub.f32 %v326_v44, %v363_v48  ;;  %v2595_v12 = vsub.f32 %v792_v5, %v2586_v8 }
 0x207   : > { %v329_v49 = vsel %vm314_vm6, %v320_v45, 0  ;;  %v321_v50 = vsel %vm314_vm6, %v320_v45, 0.0  ;;  %1997 = vmatprep.subr.mxu0 %v2403_v46  ;;  %v2576_v3 = vsub.f32 %v794_v0, %v2573_v1  ;;  %v2584_v7 = vsub.f32 %v793_v2, %v2578_v4 }
 0x208   : > { %v398_v51 = vand.u32 4294901760, %v329_v49  ;;  %322 = vadd.xlane.f32.xlu0 %v321_v50  ;;  %1998 = vmatpush3.msra.mxu0 %v363_v48  ;;  %v439_v55 = vand.u32 4294901760, %v438_v52  ;;  %v446_v56 = vand.u32 4294901760, %v445_v53  ;;  %v924_v16 = vand.u32 4294901760, %v2595_v12 }
 0x209   : > { %2009 = vmatprep.subr.mxu0 %v2403_v46  ;;  %v910_v6 = vand.u32 4294901760, %v2576_v3  ;;  %v917_v11 = vand.u32 4294901760, %v2584_v7  ;;  %v2606_v17 = vsub.f32 %v791_v9, %v2597_v13 }
 0x20a   : > { %v399_v54 = vsub.f32 %v329_v49, %v398_v51  ;;  %v440_v58 = vsub.f32 %v438_v52, %v439_v55  ;;  %v447_v59 = vsub.f32 %v445_v53, %v446_v56  ;;  %v925_v19 = vsub.f32 %v2595_v12, %v924_v16 }
 0x20b   : > { %v911_v10 = vsub.f32 %v2576_v3, %v910_v6  ;;  %v918_v15 = vsub.f32 %v2584_v7, %v917_v11  ;;  %v931_v20 = vand.u32 4294901760, %v2606_v17 }
 0x20c   : > { %v400_v57 = vand.u32 4294901760, %v399_v54  ;;  %v441_v61 = vand.u32 4294901760, %v440_v58  ;;  %v448_v62 = vand.u32 4294901760, %v447_v59  ;;  %v926_v21 = vand.u32 4294901760, %v925_v19 }
 0x20d   : > { %v912_v14 = vand.u32 4294901760, %v911_v10  ;;  %v919_v18 = vand.u32 4294901760, %v918_v15  ;;  %v932_v22 = vsub.f32 %v2606_v17, %v931_v20 }
 0x20e   : > { %v401_v60 = vsub.f32 %v399_v54, %v400_v57  ;;  %2003 = vmatpush3.msra.mxu1 %v441_v61  ;;  %v1290_v61 = vld [vmem:[#allocation8 + $0x20] sm:$0xff] }
 0x20f   : > { %2004 = vmatprep.subr.mxu1 %v2403_v46  ;;  %v933_v23 = vand.u32 4294901760, %v932_v22 }
 0x210   : > { %v402_v63 = vand.u32 4294901760, %v401_v60  ;;  %2005 = vmatpush3.msra.mxu1 %v448_v62 }
 0x211   : > { %2007 = vmatmul.mubr.f32.vlgmr.msra.gmra.mxu1 %v398_v51  ;;  %2016 = vmatprep.subr.mxu1 %v2403_v46 }
 0x212   : > { %2000 = vmatmul.mubr.f32.vlgmr.msra.gmra.mxu0 %v402_v63  ;;  %2017 = vmatpush3.msra.mxu1 %v360_v47 }
 0x213   : > { %2010 = vmatpush3.msra.mxu0 %v438_v52  ;;  %2013 = vmatprep.mubr.msk.f32.mxu0 %vm2404_vm7, %v2403_v46  ;;  %v1293_v52 = vld [vmem:[#allocation8 + $0x38] sm:$0xff] }
 0x214   : > { %2011 = vmatprep.subr.mxu0 %v2403_v46  ;;  %2018 = vmatprep.subr.mxu1 %v2403_v46 }
 0x215   : > { %2012 = vmatpush3.msra.mxu0 %v445_v53  ;;  %2019 = vmatpush3.msra.mxu1 %v363_v48  ;;  %v2670_v53 = vand.u32 4294901760, %v1293_v52 }
 0x216   : > { %2014 = vmatmul.mubr.f32.vlgmr.msra.gmra.mxu0 %v399_v54  ;;  %2023 = vmatprep.subr.mxu0 %v2403_v46  ;;  %v1292_v54 = vld [vmem:[#allocation8 + $0x30] sm:$0xff] }
 0x217   : > { %2020 = vmatprep.mubr.msk.f32.mxu1 %vm2404_vm7, %v2403_v46  ;;  %2024 = vmatpush3.msra.mxu0 %v439_v55  ;;  %v2673_v55 = vsub.f32 %v1293_v52, %v2670_v53 }
 0x218   : > { %2021 = vmatmul.mubr.f32.vlgmr.msra.gmra.mxu1 %v400_v57  ;;  %2025 = vmatprep.subr.mxu0 %v2403_v46  ;;  %v1291_v57 = vld [vmem:[#allocation8 + $0x28] sm:$0xff] }
 0x219   : > { %2030 = vmatprep.subr.mxu1 %v2403_v46  ;;  %2026 = vmatpush3.msra.mxu0 %v446_v56  ;;  %v2675_v56 = vand.u32 4294901760, %v1292_v54  ;;  %v1408_v58 = vand.u32 4294901760, %v2673_v55  ;;  %v2683_v60 = vand.u32 4294901760, %v1291_v57 }
 0x21a   : > { %2027 = vmatprep.mubr.msk.f32.mxu0 %vm2404_vm7, %v2403_v46  ;;  %2031 = vmatpush3.msra.mxu1 %v360_v47 }
 0x21b   : > { %2028 = vmatmul.mubr.f32.vlgmr.msra.gmra.mxu0 %v398_v51  ;;  %2032 = vmatprep.subr.mxu1 %v2403_v46  ;;  %v2681_v59 = vsub.f32 %v1292_v54, %v2675_v56  ;;  %v1409_v62 = vsub.f32 %v2673_v55, %v1408_v58  ;;  %v2692_v0 = vsub.f32 %v1291_v57, %v2683_v60 }
 0x21c   : > { %2033 = vmatpush3.msra.mxu1 %v363_v48  ;;  %2034 = vmatprep.mubr.msk.f32.mxu1 %vm2404_vm7, %v2403_v46 }
 0x21d   : > { %2035 = vmatmul.mubr.f32.vlgmr.msra.gmra.mxu1 %v398_v51  ;;  %2048 = vmatprep.subr.mxu1 %v2403_v46  ;;  %v1415_v63 = vand.u32 4294901760, %v2681_v59  ;;  %v1410_v2 = vand.u32 4294901760, %v1409_v62 }
 0x21e   : > { %2037 = vmatprep.subr.mxu0 %v2403_v46  ;;  %2056 = vmatprep.mubr.msk.f32.mxu1 %vm2404_vm7, %v2403_v46 }
 0x21f   : > { %2045 = vmatprep.mubr.msk.f32.mxu0 %vm2404_vm7, %v2403_v46  ;;  %2038 = vmatpush3.msra.mxu0 %v2573_v1 }
 0x220   : > { %2039 = vmatprep.subr.mxu0 %v2403_v46  ;;  %2049 = vmatpush3.msra.mxu1 %v912_v14 }
 0x221   : > { %2040 = vmatpush3.msra.mxu0 %v2578_v4  ;;  %2050 = vmatprep.subr.mxu1 %v2403_v46 }
 0x222   : > { %2041 = vmatprep.subr.mxu0 %v2403_v46  ;;  %2051 = vmatpush3.msra.mxu1 %v919_v18  ;;  %v1882_v18 = vld [vmem:[#allocation8 + $0x40] ss:$0 sm:$0xff] }
 0x223   : > { %2042 = vmatpush3.msra.mxu0 %v2586_v8  ;;  %2052 = vmatprep.subr.mxu1 %v2403_v46 }
 0x224   : > { %2043 = vmatprep.subr.mxu0 %v2403_v46  ;;  %2053 = vmatpush3.msra.mxu1 %v926_v21 }
 0x225   : > { %2044 = vmatpush3.msra.mxu0 %v2597_v13  ;;  %2054 = vmatprep.subr.mxu1 %v2403_v46 }
 0x226   : > { %2059 = vmatprep.subr.mxu0 %v2403_v46  ;;  %2055 = vmatpush3.msra.mxu1 %v933_v23 }
 0x227   : > { %2070 = vmatprep.subr.mxu1 %v2403_v46 }
 0x291   : > { %v323_v24 = vpop.xlane.xlu0 %322 }
 0x292   : > { %v324_v25 = vmax.f32 %v323_v24, 1.0 }
 0x294   : > { %2244 = vrcp.f32 %v324_v25 }
 0x2a1   : > { %v2245_v39 = vpop.eup %2244 }
 0x2d1   : > { %v485_v28 = vpop.f32.mrf.mxu1 }
 0x2d2   : > { %v404_v26 = vpop.f32.mrf.mxu0 }
 0x2d3   : > { %v486_v29 = vadd.f32 %v485_v28, %v404_v26  ;;  %v2008_v30 = vpop.f32.mrf.mxu1 }
 0x2d4   : > { %v2001_v27 = vpop.f32.mrf.mxu0 }
 0x2d6   : > { %v561_v31 = vpop.f32.mrf.mxu0 }
 0x2d7   : > { %v562_v32 = vadd.f32 %v561_v31, %v486_v29 }
 0x2d8   : > { %v2015_v33 = vpop.f32.mrf.mxu0  ;;  %v636_v34 = vpop.f32.mrf.mxu1 }
 0x2d9   : > { %v637_v35 = vadd.f32 %v636_v34, %v562_v32 }
 0x2da   : > { %v2022_v36 = vpop.f32.mrf.mxu1 }
 0x2db   : > { %v713_v37 = vpop.f32.mrf.mxu0 }
 0x2dc   : > { %v714_v38 = vadd.f32 %v713_v37, %v637_v35 }
 0x2dd   : > { %v2029_v40 = vpop.f32.mrf.mxu0  ;;  %v786_v41 = vpop.f32.mrf.mxu1 }
 0x2de   : > { %v787_v42 = vadd.f32 %v786_v41, %v714_v38 }
 0x2df   : > { %v2036_v43 = vpop.f32.mrf.mxu1 }
 0x2e0   : > { %v790_v44 = vmul.f32 %v2245_v39, %v787_v42 }
 0x2e2   : > { %v802_v45 = vsel %vm800_vm8, %v790_v44, 0  ;;  %v1883_v44 = vld [vmem:[#allocation8 + $0x41] ss:$0 sm:$0xff] }
 0x2e3   : > { %v873_v47 = vand.u32 4294901760, %v802_v45 }
 0x2e5   : > { %v874_v48 = vsub.f32 %v802_v45, %v873_v47  ;;  %2057 = vmatmul.mubr.f32.vlgmr.msra.gmra.mxu1 %v873_v47 }
 0x2e6   : > { %2071 = vmatpush3.msra.mxu1 %v2573_v1  ;;  %2078 = vmatprep.mubr.msk.f32.mxu1 %vm2404_vm7, %v2403_v46 }
 0x2e7   : > { %2072 = vmatprep.subr.mxu1 %v2403_v46  ;;  %v875_v49 = vand.u32 4294901760, %v874_v48 }
 0x2e8   : > { %2073 = vmatpush3.msra.mxu1 %v2578_v4 }
 0x2e9   : > { %2074 = vmatprep.subr.mxu1 %v2403_v46  ;;  %v876_v50 = vsub.f32 %v874_v48, %v875_v49 }
 0x2ea   : > { %2075 = vmatpush3.msra.mxu1 %v2586_v8 }
 0x2eb   : > { %2076 = vmatprep.subr.mxu1 %v2403_v46  ;;  %v877_v51 = vand.u32 4294901760, %v876_v50 }
 0x2ec   : > { %2077 = vmatpush3.msra.mxu1 %v2597_v13 }
 0x2ed   : > { %2079 = vmatmul.mubr.f32.vlgmr.msra.gmra.mxu1 %v875_v49  ;;  %2092 = vmatprep.subr.mxu1 %v2403_v46 }
 0x2ee   : > { %2046 = vmatmul.mubr.f32.vlgmr.msra.gmra.mxu0 %v877_v51  ;;  %2093 = vmatpush3.msra.mxu1 %v2573_v1  ;;  %v2694_v1 = vand.u32 4294901760, %v1290_v61 }
 0x2ef   : > { %2060 = vmatpush3.msra.mxu0 %v2576_v3  ;;  %2094 = vmatprep.subr.mxu1 %v2403_v46  ;;  %v1416_v3 = vsub.f32 %v2681_v59, %v1415_v63 }
 0x2f0   : > { %2061 = vmatprep.subr.mxu0 %v2403_v46  ;;  %2095 = vmatpush3.msra.mxu1 %v2578_v4  ;;  %v1422_v4 = vand.u32 4294901760, %v2692_v0  ;;  %v2703_v5 = vsub.f32 %v1290_v61, %v2694_v1 }
 0x2f1   : > { %2062 = vmatpush3.msra.mxu0 %v2584_v7  ;;  %2096 = vmatprep.subr.mxu1 %v2403_v46 }
 0x2f2   : > { %2063 = vmatprep.subr.mxu0 %v2403_v46  ;;  %2097 = vmatpush3.msra.mxu1 %v2586_v8  ;;  %v1423_v7 = vsub.f32 %v2692_v0, %v1422_v4  ;;  %v1429_v8 = vand.u32 4294901760, %v2703_v5 }
 0x2f3   : > { %2064 = vmatpush3.msra.mxu0 %v2595_v12  ;;  %2098 = vmatprep.subr.mxu1 %v2403_v46 }
 0x2f4   : > { %2065 = vmatprep.subr.mxu0 %v2403_v46  ;;  %2067 = vmatprep.mubr.msk.f32.mxu0 %vm2404_vm7, %v2403_v46  ;;  %v1424_v9 = vand.u32 4294901760, %v1423_v7  ;;  %v1430_v10 = vsub.f32 %v2703_v5, %v1429_v8 }
 0x2f5   : > { %2066 = vmatpush3.msra.mxu0 %v2606_v17  ;;  %2099 = vmatpush3.msra.mxu1 %v2597_v13 }
 0x2f6   : > { %2100 = vmatprep.mubr.msk.f32.mxu1 %vm2404_vm7, %v2403_v46  ;;  %2068 = vmatmul.mubr.f32.vlgmr.msra.gmra.mxu0 %v874_v48 }
 0x2f7   : > { %2081 = vmatprep.subr.mxu0 %v2403_v46  ;;  %2101 = vmatmul.mubr.f32.vlgmr.msra.gmra.mxu1 %v873_v47 }
 0x2f8   : > { %2082 = vmatpush3.msra.mxu0 %v910_v6  ;;  %2089 = vmatprep.mubr.msk.f32.mxu0 %vm2404_vm7, %v2403_v46  ;;  %v1417_v6 = vand.u32 4294901760, %v1416_v3 }
 0x2f9   : > { %2083 = vmatprep.subr.mxu0 %v2403_v46  ;;  %2114 = vmatprep.subr.mxu1 %v2403_v46 }
 0x2fa   : > { %2084 = vmatpush3.msra.mxu0 %v917_v11  ;;  %2122 = vmatprep.mubr.msk.f32.mxu1 %vm2404_vm7, %v2403_v46  ;;  %v1431_v11 = vand.u32 4294901760, %v1430_v10 }
 0x2fb   : > { %2085 = vmatprep.subr.mxu0 %v2403_v46  ;;  %2115 = vmatpush3.msra.mxu1 %v1410_v2 }
 0x2fc   : > { %2086 = vmatpush3.msra.mxu0 %v924_v16  ;;  %2116 = vmatprep.subr.mxu1 %v2403_v46 }
 0x2fd   : > { %2087 = vmatprep.subr.mxu0 %v2403_v46  ;;  %2117 = vmatpush3.msra.mxu1 %v1417_v6 }
 0x2fe   : > { %2088 = vmatpush3.msra.mxu0 %v931_v20  ;;  %2118 = vmatprep.subr.mxu1 %v2403_v46 }
 0x2ff   : > { %2090 = vmatmul.mubr.f32.vlgmr.msra.gmra.mxu0 %v873_v47  ;;  %2103 = vmatprep.subr.mxu0 %v2403_v46 }
 0x300   : > { %2111 = vmatprep.mubr.msk.f32.mxu0 %vm2404_vm7, %v2403_v46  ;;  %2104 = vmatpush3.msra.mxu0 %v2670_v53 }
 0x301   : > { %2105 = vmatprep.subr.mxu0 %v2403_v46  ;;  %2119 = vmatpush3.msra.mxu1 %v1424_v9 }
 0x302   : > { %2106 = vmatpush3.msra.mxu0 %v2675_v56  ;;  %2120 = vmatprep.subr.mxu1 %v2403_v46 }
 0x303   : > { %2107 = vmatprep.subr.mxu0 %v2403_v46  ;;  %2121 = vmatpush3.msra.mxu1 %v1431_v11 }
 0x304   : > { %2108 = vmatpush3.msra.mxu0 %v2683_v60  ;;  %2136 = vmatprep.subr.mxu1 %v2403_v46 }
 0x305   : > { %2109 = vmatprep.subr.mxu0 %v2403_v46 }
 0x306   : > { %2110 = vmatpush3.msra.mxu0 %v2694_v1 }
 0x307   : > { %2125 = vmatprep.subr.mxu0 %v2403_v46 }
 0x3a5   : > { %v970_v12 = vpop.f32.mrf.mxu1 }
 0x3a7   : > { %v2058_v13 = vpop.f32.mrf.mxu1 }
 0x3ad   : > { %v1127_v14 = vpop.f32.mrf.mxu1 }
 0x3ae   : > { %v879_v15 = vpop.f32.mrf.mxu0 }
 0x3af   : > { %v2080_v16 = vpop.f32.mrf.mxu1  ;;  %v880_v19 = vadd.f32 %v1882_v18, %v879_v15 }
 0x3b0   : > { %v2047_v17 = vpop.f32.mrf.mxu0 }
 0x3b1   : > { %v971_v22 = vadd.f32 %v970_v12, %v880_v19 }
 0x3b6   : > { %v1050_v20 = vpop.f32.mrf.mxu0 }
 0x3b7   : > { %v1285_v21 = vpop.f32.mrf.mxu1  ;;  %v1051_v25 = vadd.f32 %v1050_v20, %v971_v22 }
 0x3b8   : > { %v2069_v23 = vpop.f32.mrf.mxu0 }
 0x3b9   : > { %v2102_v24 = vpop.f32.mrf.mxu1  ;;  %v1128_v26 = vadd.f32 %v1127_v14, %v1051_v25 }
 0x3bf   : > { %v1210_v27 = vpop.f32.mrf.mxu0 }
 0x3c0   : > { %v1211_v28 = vadd.f32 %v1210_v27, %v1128_v26 }
 0x3c1   : > { %v2091_v29 = vpop.f32.mrf.mxu0 }
 0x3c2   : > { %v1286_v30 = vadd.f32 %v1285_v21, %v1211_v28 }
 0x3c4   : > { %v1289_v31 = vmax.f32 %v1286_v30, 0.0 }
 0x3c6   : > { %v1300_v32 = vsel %vm800_vm8, %v1289_v31, 0 }
 0x3c7   : > { %v1371_v33 = vand.u32 4294901760, %v1300_v32 }
 0x3c9   : > { %v1372_v34 = vsub.f32 %v1300_v32, %v1371_v33  ;;  %2123 = vmatmul.mubr.f32.vlgmr.msra.gmra.mxu1 %v1371_v33 }
 0x3ca   : > { %2137 = vmatpush3.msra.mxu1 %v2670_v53  ;;  %2144 = vmatprep.mubr.msk.f32.mxu1 %vm2404_vm7, %v2403_v46 }
 0x3cb   : > { %2138 = vmatprep.subr.mxu1 %v2403_v46  ;;  %v1373_v35 = vand.u32 4294901760, %v1372_v34 }
 0x3cc   : > { %2139 = vmatpush3.msra.mxu1 %v2675_v56 }
 0x3cd   : > { %2140 = vmatprep.subr.mxu1 %v2403_v46  ;;  %v1374_v36 = vsub.f32 %v1372_v34, %v1373_v35 }
 0x3ce   : > { %2141 = vmatpush3.msra.mxu1 %v2683_v60 }
 0x3cf   : > { %2142 = vmatprep.subr.mxu1 %v2403_v46  ;;  %v1375_v37 = vand.u32 4294901760, %v1374_v36 }
 0x3d0   : > { %2143 = vmatpush3.msra.mxu1 %v2694_v1 }
 0x3d1   : > { %2145 = vmatmul.mubr.f32.vlgmr.msra.gmra.mxu1 %v1373_v35  ;;  %2158 = vmatprep.subr.mxu1 %v2403_v46 }
 0x3d2   : > { %2112 = vmatmul.mubr.f32.vlgmr.msra.gmra.mxu0 %v1375_v37  ;;  %2159 = vmatpush3.msra.mxu1 %v2670_v53 }
 0x3d3   : > { %2126 = vmatpush3.msra.mxu0 %v2673_v55  ;;  %2160 = vmatprep.subr.mxu1 %v2403_v46 }
 0x3d4   : > { %2127 = vmatprep.subr.mxu0 %v2403_v46  ;;  %2161 = vmatpush3.msra.mxu1 %v2675_v56 }
 0x3d5   : > { %2128 = vmatpush3.msra.mxu0 %v2681_v59  ;;  %2162 = vmatprep.subr.mxu1 %v2403_v46 }
 0x3d6   : > { %2129 = vmatprep.subr.mxu0 %v2403_v46  ;;  %2163 = vmatpush3.msra.mxu1 %v2683_v60 }
 0x3d7   : > { %2130 = vmatpush3.msra.mxu0 %v2692_v0  ;;  %2164 = vmatprep.subr.mxu1 %v2403_v46 }
 0x3d8   : > { %2131 = vmatprep.subr.mxu0 %v2403_v46  ;;  %2133 = vmatprep.mubr.msk.f32.mxu0 %vm2404_vm7, %v2403_v46 }
 0x3d9   : > { %2132 = vmatpush3.msra.mxu0 %v2703_v5  ;;  %2165 = vmatpush3.msra.mxu1 %v2694_v1 }
 0x3da   : > { %2166 = vmatprep.mubr.msk.f32.mxu1 %vm2404_vm7, %v2403_v46  ;;  %2134 = vmatmul.mubr.f32.vlgmr.msra.gmra.mxu0 %v1372_v34 }
 0x3db   : > { %2147 = vmatprep.subr.mxu0 %v2403_v46  ;;  %2167 = vmatmul.mubr.f32.vlgmr.msra.gmra.mxu1 %v1371_v33 }
 0x3dc   : > { %2148 = vmatpush3.msra.mxu0 %v1408_v58  ;;  %2155 = vmatprep.mubr.msk.f32.mxu0 %vm2404_vm7, %v2403_v46 }
 0x3dd   : > { %2149 = vmatprep.subr.mxu0 %v2403_v46 }
 0x3de   : > { %2150 = vmatpush3.msra.mxu0 %v1415_v63 }
 0x3df   : > { %2151 = vmatprep.subr.mxu0 %v2403_v46 }
 0x3e0   : > { %2152 = vmatpush3.msra.mxu0 %v1422_v4 }
 0x3e1   : > { %2153 = vmatprep.subr.mxu0 %v2403_v46 }
 0x3e2   : > { %2154 = vmatpush3.msra.mxu0 %v1429_v8 }
 0x3e3   : > { %2156 = vmatmul.mubr.f32.vlgmr.msra.gmra.mxu0 %v1371_v33 }
 0x489   : > { %v1468_v38 = vpop.f32.mrf.mxu1 }
 0x48b   : > { %v2124_v39 = vpop.f32.mrf.mxu1 }
 0x491   : > { %v1625_v40 = vpop.f32.mrf.mxu1 }
 0x492   : > { %v1377_v41 = vpop.f32.mrf.mxu0 }
 0x493   : > { %v2146_v42 = vpop.f32.mrf.mxu1  ;;  %v1378_v45 = vadd.f32 %v1883_v44, %v1377_v41 }
 0x494   : > { %v2113_v43 = vpop.f32.mrf.mxu0 }
 0x495   : > { %v1469_v49 = vadd.f32 %v1468_v38, %v1378_v45 }
 0x49a   : > { %v1548_v47 = vpop.f32.mrf.mxu0 }
 0x49b   : > { %v1783_v48 = vpop.f32.mrf.mxu1  ;;  %v1549_v52 = vadd.f32 %v1548_v47, %v1469_v49 }
 0x49c   : > { %v2135_v50 = vpop.f32.mrf.mxu0 }
 0x49d   : > { %v2168_v51 = vpop.f32.mrf.mxu1  ;;  %v1626_v53 = vadd.f32 %v1625_v40, %v1549_v52 }
 0x4a3   : > { %v1708_v46 = vpop.f32.mrf.mxu0 }
 0x4a4   : > { %v1709_v54 = vadd.f32 %v1708_v46, %v1626_v53 }
 0x4a5   : > { %v2157_v55 = vpop.f32.mrf.mxu0 }
 0x4a6   : > { %v1784_v56 = vadd.f32 %v1783_v48, %v1709_v54 }
 0x4a8   : > { %1787 = vst [vmem:[#allocation9] sm:$0xff] %v1784_v56 }
 0x4a9 PF: > { %p2199_p12 = scmp.eq.s32.totalorder %s2445_s16, 1  ;;  %s2405_s17 = smov [#allocation9]  }
 0x4aa   : > { %s1795_s18 = sshll.u32 %s2405_s17, 4  ;;  %s1796_s18 = int_to_ptr.vmem [resolvable:$true] %s1795_s18 }
 0x4ab   : > { %s2326_s19 = scalar_lea.vmem %s1796_s18, 128  ;;  %p2333_p0 = scmp.lt.s32.totalorder %s1796_s18, %s1796_s18 }
 0x4ac   : > { %p2327_p1 = scmp.ne.s32.totalorder %s1796_s18, %s2326_s19  ;;  %p2334_p2 = scmp.lt.s32.totalorder %s2326_s19, %s2326_s19 }
 0x4ae   : > { %p2328_p4 = pnand %p2327_p1, %p2199_p12  ;;  %p2335_p3 = por %p2334_p2, %p2333_p0 }
 0x4b0   : > { %p2329_p9 = pneg %p2328_p4 }
 0x4b2   : > { %p2336_p10 = pnand %p2335_p3, %p2329_p9 }
 0x4b4   : > { %2339 = shalt.err (!%p2336_p10)
}
 0x4b5   : > { %2180 = dma.vmem_to_hbm [thread:$0]  (%p2199_p12), %s1796_s18, 128, %s2789_s3, [#allocation5]  }
 0x4b6   : > { %2375 = dma.done.wait (%p2199_p12), [#allocation5], 128  }
 0x4b7   : > { %2377 = vsyncadd (%p2199_p12), [#allocation5], 4294967168 }
 0x4b8 PF: > { %p15_p11 = scmp.ge.s32.totalorder %s2489_s5, 4   ;;  %s2802_s12 = smov %s2384_s13 }
 0x4b9   : > { %s2803_s13 = smov %s2388_s14  ;;  %s2804_s14 = smov %s2500_s9 }
 0x4ba   : > { %s2805_s15 = smov %s2489_s5  ;;  %17 = sbr.rel (!%p15_p11) target bundleno = 5 (0x5), region = 85 }
 0x4bf   :  { %1808 = vsyncpa [#allocation4], 1 }
 0x4c0   :  { %1810 = vsyncpa [#allocation4 + $0x1], 1 }
 0x4c1   :  { %1811 = vsyncpa [#allocation7], 1 }
 0x4c2   :  { %1812 = vsyncpa [#allocation5], 1 }
 0x4c3   :  { %1814 = vsyncpa [#allocation5 + $0x1], 1 }

</bundles_post_ra>
